<compile_context>
chip_gen: v5e
topology: v5e:2x2
jax: 0.10.0
libtpu: 0.0.40
codegen_flags: <defaults>
</compile_context>

<pallas_src>
import functools

import jax
import jax.numpy as jnp
from jax.experimental import pallas as pl
from jax.experimental.pallas import tpu as pltpu


def _round_up(x, m):
    return ((x + m - 1) // m) * m


def _critic_kernel(obs_ref, w1_ref, b1_ref, w2_ref, b2_ref, w3t_ref, b3_ref,
                   out_ref, *, mxu_dtype):
    """One batch tile: v = tanh(tanh(x@W1+b1)@W2+b2) . w3 + b3 (lane-dense)."""

    def mm_operands(a, b):
        # Cast *both* MXU operands (casting only one side would silently
        # re-promote to f32).  Accumulation stays f32 via
        # preferred_element_type; elementwise math below stays f32 (v5e-safe).
        if mxu_dtype is not None:
            return a.astype(mxu_dtype), b.astype(mxu_dtype)
        return a, b

    x, w1 = mm_operands(obs_ref[...], w1_ref[...])
    h1 = jnp.dot(x, w1, preferred_element_type=jnp.float32)
    h1 = jnp.tanh(h1 + b1_ref[...])                      # (TB, H), f32

    a1, w2 = mm_operands(h1, w2_ref[...])
    h2 = jnp.dot(a1, w2, preferred_element_type=jnp.float32)
    h2 = jnp.tanh(h2 + b2_ref[...])                      # (TB, H), f32

    # Value head: contract (1, H) with (TB, H) along H -> (1, TB).  Batch
    # stays on the lane axis so the store is a full-width vst (no masked
    # width-1 stores and no in-kernel (TB,1)->(1,TB) relayout).
    a2, w3t = mm_operands(h2, w3t_ref[...])
    v = jax.lax.dot_general(
        w3t, a2,
        dimension_numbers=(((1,), (1,)), ((), ())),
        preferred_element_type=jnp.float32)              # (1, TB)

    out_ref[...] = (v + b3_ref[0]).astype(out_ref.dtype)


# Per-TensorCore VMEM working-set budget for tile sizing (v7x: 64 MiB physical
# per TC, so stay well under it) and the scoped-VMEM limit we request.
_VMEM_BUDGET_BYTES = 40 * 1024 * 1024
_VMEM_LIMIT_BYTES = 48 * 1024 * 1024


def critic_forward(obs, params, *, block_b=8192, mxu_dtype=None):
    """Pallas-backed Critic.forward: obs [B, obs_dim] -> values [B].

    mxu_dtype: optional dtype (e.g. jnp.bfloat16) for MXU matmul operands.
    Bias-add/tanh always stay f32 and accumulation is always f32; leave None
    for bit-faithful f32 matmuls.
    """
    w1, b1, w2, b2, w3, b3 = params
    B, obs_dim = obs.shape
    H = w1.shape[1]

    # ---- Batch-tile selection -------------------------------------------
    #  * multiple of 128 (lane width) so the (1, TB) output row is lane-dense,
    #  * at least 2 grid blocks whenever B allows it (v7x megacore),
    #  * capped so double-buffered *lane-padded* obs tiles + f32 h1/h2
    #    activations (+ worst-case bf16 MXU copies) fit the VMEM budget.
    block_b = max(128, _round_up(int(block_b), 128))
    tb_two_blocks = max(128, _round_up((B + 1) // 2, 128))
    obs_itemsize = jnp.dtype(obs.dtype).itemsize
    bytes_per_row = (2 * _round_up(obs_dim, 128) * obs_itemsize   # obs, 2 bufs
                     + 2 * _round_up(H, 128) * 4                  # h1, h2 (f32)
                     + 2 * _round_up(H, 128) * 2)                 # bf16 copies
    tb_vmem_cap = max(128, ((_VMEM_BUDGET_BYTES // bytes_per_row) // 128) * 128)
    TB = min(block_b, tb_two_blocks, tb_vmem_cap)

    num_blocks = pl.cdiv(B, TB)
    B_pad = num_blocks * TB

    # NOTE: obs is deliberately NOT padded.  A jnp.pad would cost a full extra
    # HBM read+write of the dominant stream; instead the ragged last obs tile
    # reads out-of-bounds rows whose garbage results land in output lanes that
    # are sliced away below.  This is safe because batch rows are independent
    # (never reduce across the batch axis inside this kernel).
    w3t = jnp.reshape(w3, (1, H))                        # value head as a (1, H) row
    b3s = jnp.reshape(b3, (1,)).astype(jnp.float32)      # scalar -> SMEM

    def resident(a):
        # Constant index map -> stays VMEM-resident across the whole grid.
        # (All weights total < ~200 KiB here, so the default pipeline
        # double-buffer on them is a negligible VMEM cost.)
        return pl.BlockSpec(a.shape, lambda i: (0,) * a.ndim)

    weight_bytes = sum(int(a.size) * jnp.dtype(a.dtype).itemsize
                       for a in (w1, b1, w2, b2, w3t, b3s))
    cost = pl.CostEstimate(
        flops=2 * B * (obs_dim * H + H * H + H),
        transcendentals=2 * B * H,
        bytes_accessed=B * obs_dim * obs_itemsize + weight_bytes + B_pad * 4,
    )

    out = pl.pallas_call(
        functools.partial(_critic_kernel, mxu_dtype=mxu_dtype),
        out_shape=jax.ShapeDtypeStruct((1, B_pad), jnp.float32),
        grid_spec=pltpu.PrefetchScalarGridSpec(
            num_scalar_prefetch=0,
            grid=(num_blocks,),
            in_specs=[
                # obs: streamed in (TB, obs_dim) tiles along the batch axis.
                pl.BlockSpec((TB, obs_dim), lambda i: (i, 0)),
                # Weights / biases: constant index maps -> VMEM-resident.
                resident(w1), resident(b1),
                resident(w2), resident(b2),
                resident(w3t),
                # b3 is a single scalar: keep it in SMEM (no VMEM block/DMA).
                pl.BlockSpec(memory_space=pltpu.MemorySpace.SMEM),
            ],
            out_specs=pl.BlockSpec((1, TB), lambda i: (0, i)),
        ),
        compiler_params=pltpu.CompilerParams(
            # Batch tiles are independent -> v7x splits them across its two
            # TensorCores; harmless on single-TC v5e/v6e.
            dimension_semantics=("parallel",),
            # Above v5e's 16 MiB default scoped VMEM, below v7x's 64 MiB
            # physical; covers the larger default tile.
            vmem_limit_bytes=_VMEM_LIMIT_BYTES,
        ),
        cost_estimate=cost,
    )(obs, w1, b1, w2, b2, w3t, b3s)

    vals = jnp.reshape(out, (B_pad,))[:B]
    # torch: .squeeze(-1).squeeze(-1) — the second squeeze only bites at B==1.
    if B == 1:
        vals = jnp.squeeze(vals, axis=0)
    return vals


def init_critic_params(key, obs_dim, hidden):
    """Deterministic, PyTorch-Linear-style uniform init."""
    ks = jax.random.split(key, 6)

    def linear(kw, kb, fan_in, fan_out):
        bound = 1.0 / jnp.sqrt(jnp.float32(fan_in))
        w = jax.random.uniform(kw, (fan_in, fan_out), jnp.float32, -bound, bound)
        b = jax.random.uniform(kb, (1, fan_out), jnp.float32, -bound, bound)
        return w, b

    w1, b1 = linear(ks[0], ks[1], obs_dim, hidden)
    w2, b2 = linear(ks[2], ks[3], hidden, hidden)
    w3, b3 = linear(ks[4], ks[5], hidden, 1)
    return (w1, b1, w2, b2, w3, b3)


def pad_hidden_to_lanes(params, multiple=128):
    """Zero-pad the hidden dim to a lane multiple (mathematically inert)."""
    w1, b1, w2, b2, w3, b3 = params
    H = w1.shape[1]
    Hp = ((H + multiple - 1) // multiple) * multiple
    if Hp == H:
        return params
    p = Hp - H
    return (jnp.pad(w1, ((0, 0), (0, p))),
            jnp.pad(b1, ((0, 0), (0, p))),
            jnp.pad(w2, ((0, p), (0, p))),
            jnp.pad(b2, ((0, 0), (0, p))),
            jnp.pad(w3, ((0, p), (0, 0))),
            b3)


if __name__ == "__main__":
    key = jax.random.PRNGKey(0)
    k_obs, k_obs2, k_par = jax.random.split(key, 3)

    B, OBS_DIM, HIDDEN = 2, 16, 32
    obs = jax.random.normal(k_obs, (B, OBS_DIM), dtype=jnp.float32)
    params = init_critic_params(k_par, OBS_DIM, HIDDEN)

    # Pure-JAX reference (unpadded params).
    def ref_forward(o, p):
        w1, b1, w2, b2, w3, b3 = p
        h = jnp.tanh(o @ w1 + b1)
        h = jnp.tanh(h @ w2 + b2)
        return jnp.squeeze(h @ w3 + b3, axis=-1)

    # Lane-pad the hidden dim once at init time (zeros are inert).
    tpu_params = pad_hidden_to_lanes(params)

    # Small-batch run: single ragged tile, no input padding anywhere.
    values = jax.block_until_ready(critic_forward(obs, tpu_params))
    assert values.shape == (B,)
    assert jnp.allclose(values, ref_forward(obs, params), atol=1e-5, rtol=1e-5)

    # Larger, non-tile-multiple batch with several grid steps: exercises batch
    # tiling and the unpadded ragged last tile (garbage rows sliced away).
    B2 = 300
    obs2 = jax.random.normal(k_obs2, (B2, OBS_DIM), dtype=jnp.float32)
    ref2 = ref_forward(obs2, params)

    values2 = jax.block_until_ready(critic_forward(obs2, tpu_params, block_b=128))
    assert values2.shape == (B2,)
    assert jnp.allclose(values2, ref2, atol=1e-5, rtol=1e-5)

    # Default (large) tile + deliberate bf16 MXU flag: >=2 grid blocks
    # (megacore-friendly), bf16 obs halves the dominant HBM stream, matmuls
    # run single-pass bf16 on the MXU with f32 accumulation / f32 tanh.
    values3 = jax.block_until_ready(
        critic_forward(obs2.astype(jnp.bfloat16), tpu_params,
                       mxu_dtype=jnp.bfloat16))
    assert values3.shape == (B2,)
    assert float(jnp.max(jnp.abs(values3 - ref2))) < 5e-2

    print("KERNEL_OK")
</pallas_src>

<mosaic_0001>
module attributes {stable_mosaic.version = 11 : i64} {
  func.func @_critic_kernel(%arg0: i32, %arg1: memref<128x16xf32, #tpu.memory_space<vmem>>, %arg2: memref<16x128xf32, #tpu.memory_space<vmem>>, %arg3: memref<1x128xf32, #tpu.memory_space<vmem>>, %arg4: memref<128x128xf32, #tpu.memory_space<vmem>>, %arg5: memref<1x128xf32, #tpu.memory_space<vmem>>, %arg6: memref<1x128xf32, #tpu.memory_space<vmem>>, %arg7: memref<1xf32, #tpu.memory_space<smem>>, %arg8: memref<1x128xf32, #tpu.memory_space<vmem>>) attributes {dimension_semantics = [#tpu.dimension_semantics<parallel>], iteration_bounds = array<i64: 1>, scalar_prefetch = 0 : i64, scratch_operands = 0 : i64, tpu.core_type = #tpu.core_type<tc>, window_params = [{transform_indices = @transform_0, window_bounds = array<i64: 128, 16>}, {pipeline_mode = #tpu.pipeline_mode<synchronous>, transform_indices = @transform_1, window_bounds = array<i64: 16, 128>}, {pipeline_mode = #tpu.pipeline_mode<synchronous>, transform_indices = @transform_2, window_bounds = array<i64: 1, 128>}, {pipeline_mode = #tpu.pipeline_mode<synchronous>, transform_indices = @transform_3, window_bounds = array<i64: 128, 128>}, {pipeline_mode = #tpu.pipeline_mode<synchronous>, transform_indices = @transform_4, window_bounds = array<i64: 1, 128>}, {pipeline_mode = #tpu.pipeline_mode<synchronous>, transform_indices = @transform_5, window_bounds = array<i64: 1, 128>}, {transform_indices = @transform_6, window_bounds = array<i64: 1>}, {transform_indices = @transform_7, window_bounds = array<i64: 1, 128>}]} {
    %c0 = arith.constant 0 : index
    %c0_0 = arith.constant 0 : index
    %0 = vector.load %arg1[%c0, %c0_0] : memref<128x16xf32, #tpu.memory_space<vmem>>, vector<128x16xf32>
    %c0_1 = arith.constant 0 : index
    %c0_2 = arith.constant 0 : index
    %1 = vector.load %arg2[%c0_1, %c0_2] : memref<16x128xf32, #tpu.memory_space<vmem>>, vector<16x128xf32>
    %cst = arith.constant dense<0.000000e+00> : vector<128x128xf32>
    %2 = tpu.matmul %0, %1, %cst {dimension_numbers = #tpu.dot_dimension_numbers<[1], [0], [0], [1], [0, 0, 1, 1], [], []>} : vector<128x16xf32>, vector<16x128xf32>, vector<128x128xf32> -> vector<128x128xf32>
    %c0_3 = arith.constant 0 : index
    %c0_4 = arith.constant 0 : index
    %3 = vector.load %arg3[%c0_3, %c0_4] : memref<1x128xf32, #tpu.memory_space<vmem>>, vector<1x128xf32>
    %4 = vector.broadcast %3 : vector<1x128xf32> to vector<128x128xf32>
    %5 = arith.addf %2, %4 : vector<128x128xf32>
    %6 = math.tanh %5 : vector<128x128xf32>
    %c0_5 = arith.constant 0 : index
    %c0_6 = arith.constant 0 : index
    %7 = vector.load %arg4[%c0_5, %c0_6] : memref<128x128xf32, #tpu.memory_space<vmem>>, vector<128x128xf32>
    %cst_7 = arith.constant dense<0.000000e+00> : vector<128x128xf32>
    %8 = tpu.matmul %6, %7, %cst_7 {dimension_numbers = #tpu.dot_dimension_numbers<[1], [0], [0], [1], [0, 0, 1, 1], [], []>} : vector<128x128xf32>, vector<128x128xf32>, vector<128x128xf32> -> vector<128x128xf32>
    %c0_8 = arith.constant 0 : index
    %c0_9 = arith.constant 0 : index
    %9 = vector.load %arg5[%c0_8, %c0_9] : memref<1x128xf32, #tpu.memory_space<vmem>>, vector<1x128xf32>
    %10 = vector.broadcast %9 : vector<1x128xf32> to vector<128x128xf32>
    %11 = arith.addf %8, %10 : vector<128x128xf32>
    %12 = math.tanh %11 : vector<128x128xf32>
    %c0_10 = arith.constant 0 : index
    %c0_11 = arith.constant 0 : index
    %13 = vector.load %arg6[%c0_10, %c0_11] : memref<1x128xf32, #tpu.memory_space<vmem>>, vector<1x128xf32>
    %cst_12 = arith.constant dense<0.000000e+00> : vector<1x128xf32>
    %14 = tpu.matmul %13, %12, %cst_12 {dimension_numbers = #tpu.dot_dimension_numbers<[1], [1], [0], [0], [0, 0, 1, 0], [], []>} : vector<1x128xf32>, vector<128x128xf32>, vector<1x128xf32> -> vector<1x128xf32>
    %c0_13 = arith.constant 0 : index
    %15 = memref.load %arg7[%c0_13] : memref<1xf32, #tpu.memory_space<smem>>
    %16 = vector.broadcast %15 : f32 to vector<1x128xf32>
    %17 = arith.addf %14, %16 : vector<1x128xf32>
    %c0_14 = arith.constant 0 : index
    %c0_15 = arith.constant 0 : index
    %18 = vector.load %arg8[%c0_14, %c0_15] : memref<1x128xf32, #tpu.memory_space<vmem>>, vector<1x128xf32>
    tpu.vector_store %arg8[%c0_14, %c0_15], %17 {strides = array<i32>} : memref<1x128xf32, #tpu.memory_space<vmem>>, vector<1x128xf32>,
    return
  }
  func.func @transform_0(%arg0: i32) -> (i32, i32) {
    %c0_i32 = arith.constant 0 : i32
    %c0_i32_0 = arith.constant 0 : i32
    return %arg0, %c0_i32 : i32, i32
  }
  func.func @transform_1(%arg0: i32) -> (i32, i32) {
    %c0_i32 = arith.constant 0 : i32
    %c0_i32_0 = arith.constant 0 : i32
    %c0_i32_1 = arith.constant 0 : i32
    return %c0_i32, %c0_i32_0 : i32, i32
  }
  func.func @transform_2(%arg0: i32) -> (i32, i32) {
    %c0_i32 = arith.constant 0 : i32
    %c0_i32_0 = arith.constant 0 : i32
    %c0_i32_1 = arith.constant 0 : i32
    return %c0_i32, %c0_i32_0 : i32, i32
  }
  func.func @transform_3(%arg0: i32) -> (i32, i32) {
    %c0_i32 = arith.constant 0 : i32
    %c0_i32_0 = arith.constant 0 : i32
    %c0_i32_1 = arith.constant 0 : i32
    return %c0_i32, %c0_i32_0 : i32, i32
  }
  func.func @transform_4(%arg0: i32) -> (i32, i32) {
    %c0_i32 = arith.constant 0 : i32
    %c0_i32_0 = arith.constant 0 : i32
    %c0_i32_1 = arith.constant 0 : i32
    return %c0_i32, %c0_i32_0 : i32, i32
  }
  func.func @transform_5(%arg0: i32) -> (i32, i32) {
    %c0_i32 = arith.constant 0 : i32
    %c0_i32_0 = arith.constant 0 : i32
    %c0_i32_1 = arith.constant 0 : i32
    return %c0_i32, %c0_i32_0 : i32, i32
  }
  func.func @transform_6(%arg0: i32) -> i32 {
    %c0_i32 = arith.constant 0 : i32
    %c0_i32_0 = arith.constant 0 : i32
    return %c0_i32 : i32
  }
  func.func @transform_7(%arg0: i32) -> (i32, i32) {
    %c0_i32 = arith.constant 0 : i32
    %c0_i32_0 = arith.constant 0 : i32
    return %c0_i32, %arg0 : i32, i32
  }
}

</mosaic_0001>

<bundles_post_ra>
// kernel: tpu_custom_call.1
= control target key start
LH: loop header
LB: loop body
LE: loop exit
PB: predicated region body
PF: predicated region fallthrough
CT: control target
= control target key end

     0   :  { %13 = vsyncpa [#allocation4], 0  ;;  %s690_s0 = inlined_call_operand.vmem [shape: f32[2,16], index: 0, kind: input, shape index: {}]   ;;  %s691_s1 = inlined_call_operand.hbm [shape: f32[16,128], index: 1, kind: input, shape index: {}]   ;;  %s692_s2 = inlined_call_operand.vmem [shape: f32[1,128], index: 2, kind: input, shape index: {}]   ;;  %s693_s3 = inlined_call_operand.hbm [shape: f32[128,128], index: 3, kind: input, shape index: {}]   ;;  %s694_s4 = inlined_call_operand.vmem [shape: f32[1,128], index: 4, kind: input, shape index: {}]   ;;  %s695_s5 = inlined_call_operand.vmem [shape: f32[1,128], index: 5, kind: input, shape index: {}]   ;;  %s696_s6 = inlined_call_operand.<no memory space> [shape: f32[1], index: 6, kind: input, shape index: {}]   ;;  %s697_s7 = inlined_call_operand.hbm [shape: f32[1,128], index: 7, kind: output, shape index: {}]  }
   0x1   :  { %14 = vsyncpa [#allocation7], 0 }
   0x2   :  { %15 = vsyncpa [#allocation5], 0  ;;  %s22_s26 = sshll.u32 %s691_s1, 4  ;;  %s536_s27 = smov [#allocation3]   ;;  %s23_s26 = int_to_ptr.hbm [resolvable:$true] %s22_s26 }
   0x3   :  { %s24_s28 = sshll.u32 %s536_s27, 4  ;;  %s37_s8 = sshll.u32 %s693_s3, 4  ;;  %s25_s28 = int_to_ptr.vmem [resolvable:$true] %s24_s28  ;;  %s38_s8 = int_to_ptr.hbm [resolvable:$true] %s37_s8 }
   0x4   :  { %s537_s9 = smov 128   ;;  %s538_s10 = smov 8  }
   0x5   :  { %30 = dma.hbm_to_vmem [thread:$0]  %s23_s26, 256, %s25_s28, [#allocation4], %s537_s9, %s537_s9, %s538_s10  }
   0x6   :  { %s539_s11 = smov [#allocation6]  }
   0x7   :  { %s39_s12 = sshll.u32 %s539_s11, 4  ;;  %s40_s12 = int_to_ptr.vmem [resolvable:$true] %s39_s12 }
   0x8   :  { %45 = dma.hbm_to_vmem [thread:$0]  %s38_s8, 2048, %s40_s12, [#allocation7], %s537_s9, %s537_s9, %s538_s10  }
   0x9   :  { %530 = dma.done.wait [#allocation4], 256  }
   0xa   :  { %531 = vsyncadd [#allocation4], 4294967040 }
   0xb   :  { %532 = dma.done.wait [#allocation7], 2048  }
   0xc   :  { %533 = vsyncadd [#allocation7], 4294965248  ;;  %v77_v0 = vld [vmem:[#allocation3 + $0x8] sm:$0xff]  ;;  %v76_v1 = vld [vmem:[#allocation3] sm:$0xff]  ;;  %vm82_vm0 = vcmask 130048   ;;  %s540_s23 = smov [#allocation8]  }
   0xd   :  { %145 = vmatpush.msra.mxu0 %v77_v0  ;;  %v60_v2 = vld [vmem:[%s690_s0] sm:$0xff]  ;;  %v61_v3 = vld [vmem:[%s690_s0 + $0x8] sm:$0xff]  ;;  %v62_v4 = vld [vmem:[%s690_s0 + $0x10] sm:$0xff]  ;;  %s342_s24 = sshll.u32 %s540_s23, 4  ;;  %s344_s27 = sshll.u32 %s697_s7, 4  ;;  %s343_s24 = int_to_ptr.vmem [resolvable:$true] %s342_s24  ;;  %s345_s27 = int_to_ptr.hbm [resolvable:$true] %s344_s27 }
   0xe   :  { %v63_v5 = vld [vmem:[%s690_s0 + $0x18] sm:$0xff]  ;;  %v64_v6 = vld [vmem:[%s690_s0 + $0x20] sm:$0xff]  ;;  %v65_v7 = vld [vmem:[%s690_s0 + $0x28] sm:$0xff] }
   0xf   :  { %146 = vmatpush.msra.mxu0 %v76_v1  ;;  %v66_v8 = vld [vmem:[%s690_s0 + $0x30] sm:$0xff]  ;;  %v67_v9 = vld [vmem:[%s690_s0 + $0x38] sm:$0xff]  ;;  %v68_v10 = vld [vmem:[%s690_s0 + $0x40] sm:$0xff] }
  0x10   :  { %355 = vmatmul.msk.f32.vlgmr.msra.gmra.mxu0 %vm82_vm0, %v60_v2  ;;  %v69_v11 = vld [vmem:[%s690_s0 + $0x48] sm:$0xff]  ;;  %v226_v13 = vld [vmem:[#allocation6 + $0x70] sm:$0xff]  ;;  %v225_v14 = vld [vmem:[#allocation6 + $0x68] sm:$0xff] }
  0x11   :  { %v227_v12 = vld [vmem:[#allocation6 + $0x78] sm:$0xff]  ;;  %v224_v15 = vld [vmem:[#allocation6 + $0x60] sm:$0xff]  ;;  %v222_v18 = vld [vmem:[#allocation6 + $0x50] sm:$0xff] }
  0x12   :  { %232 = vmatpush.msra.mxu1 %v227_v12  ;;  %371 = vmatpush.msra.mxu3 %v227_v12  ;;  %v70_v16 = vld [vmem:[%s690_s0 + $0x50] sm:$0xff]  ;;  %v223_v17 = vld [vmem:[#allocation6 + $0x58] sm:$0xff]  ;;  %v221_v19 = vld [vmem:[#allocation6 + $0x48] sm:$0xff] }
  0x13   :  { %v220_v20 = vld [vmem:[#allocation6 + $0x40] sm:$0xff]  ;;  %v71_v21 = vld [vmem:[%s690_s0 + $0x58] sm:$0xff]  ;;  %v219_v22 = vld [vmem:[#allocation6 + $0x38] sm:$0xff] }
  0x14   :  { %233 = vmatpush.msra.mxu1 %v226_v13  ;;  %372 = vmatpush.msra.mxu3 %v226_v13  ;;  %v218_v23 = vld [vmem:[#allocation6 + $0x30] sm:$0xff]  ;;  %v217_v24 = vld [vmem:[#allocation6 + $0x28] sm:$0xff]  ;;  %v216_v26 = vld [vmem:[#allocation6 + $0x20] sm:$0xff] }
  0x15   :  { %v72_v25 = vld [vmem:[%s690_s0 + $0x60] sm:$0xff]  ;;  %v215_v27 = vld [vmem:[#allocation6 + $0x18] sm:$0xff]  ;;  %v213_v29 = vld [vmem:[#allocation6 + $0x8] sm:$0xff] }
  0x16   :  { %234 = vmatpush.msra.mxu1 %v225_v14  ;;  %373 = vmatpush.msra.mxu3 %v225_v14  ;;  %v214_v28 = vld [vmem:[#allocation6 + $0x10] sm:$0xff]  ;;  %v73_v30 = vld [vmem:[%s690_s0 + $0x68] sm:$0xff]  ;;  %v212_v31 = vld [vmem:[#allocation6] sm:$0xff] }
  0x17   :  { %v74_v32 = vld [vmem:[%s690_s0 + $0x70] sm:$0xff]  ;;  %v75_v33 = vld [vmem:[%s690_s0 + $0x78] sm:$0xff]  ;;  %v654_v34 = vld [vmem:[%s692_s2] ss:$0 sm:$0xff] }
  0x18   :  { %356 = vmatmul.msk.f32.gmra.mxu0 %vm82_vm0, %v61_v3  ;;  %235 = vmatpush.msra.mxu1 %v224_v15 }
  0x19   :  { %374 = vmatpush.msra.mxu3 %v224_v15 }
  0x1a   :  { %236 = vmatpush.msra.mxu1 %v223_v17 }
  0x1b   :  { %375 = vmatpush.msra.mxu3 %v223_v17 }
  0x1c   :  { %237 = vmatpush.msra.mxu1 %v222_v18 }
  0x1d   :  { %376 = vmatpush.msra.mxu3 %v222_v18 }
  0x1e   :  { %238 = vmatpush.msra.mxu1 %v221_v19 }
  0x1f   :  { %377 = vmatpush.msra.mxu3 %v221_v19 }
  0x20   :  { %357 = vmatmul.msk.f32.gmra.mxu0 %vm82_vm0, %v62_v4  ;;  %239 = vmatpush.msra.mxu1 %v220_v20 }
  0x21   :  { %378 = vmatpush.msra.mxu3 %v220_v20 }
  0x22   :  { %240 = vmatpush.msra.mxu1 %v219_v22 }
  0x23   :  { %379 = vmatpush.msra.mxu3 %v219_v22 }
  0x24   :  { %241 = vmatpush.msra.mxu1 %v218_v23 }
  0x25   :  { %380 = vmatpush.msra.mxu3 %v218_v23 }
  0x26   :  { %242 = vmatpush.msra.mxu1 %v217_v24 }
  0x27   :  { %381 = vmatpush.msra.mxu3 %v217_v24 }
  0x28   :  { %358 = vmatmul.msk.f32.gmra.mxu0 %vm82_vm0, %v63_v5  ;;  %243 = vmatpush.msra.mxu1 %v216_v26 }
  0x29   :  { %382 = vmatpush.msra.mxu3 %v216_v26 }
  0x2a   :  { %244 = vmatpush.msra.mxu1 %v215_v27 }
  0x2b   :  { %383 = vmatpush.msra.mxu3 %v215_v27 }
  0x2c   :  { %245 = vmatpush.msra.mxu1 %v214_v28 }
  0x2d   :  { %384 = vmatpush.msra.mxu3 %v214_v28 }
  0x2e   :  { %246 = vmatpush.msra.mxu1 %v213_v29 }
  0x2f   :  { %385 = vmatpush.msra.mxu3 %v213_v29 }
  0x30   :  { %359 = vmatmul.msk.f32.gmra.mxu0 %vm82_vm0, %v64_v6  ;;  %247 = vmatpush.msra.mxu1 %v212_v31 }
  0x31   :  { %386 = vmatpush.msra.mxu3 %v212_v31  ;;  %v393_v31 = vld [vmem:[%s694_s4] ss:$0 sm:$0xff] }
  0x38   :  { %360 = vmatmul.msk.f32.gmra.mxu0 %vm82_vm0, %v65_v7 }
  0x40   :  { %361 = vmatmul.msk.f32.gmra.mxu0 %vm82_vm0, %v66_v8 }
  0x48   :  { %362 = vmatmul.msk.f32.gmra.mxu0 %vm82_vm0, %v67_v9 }
  0x50   :  { %363 = vmatmul.msk.f32.gmra.mxu0 %vm82_vm0, %v68_v10 }
  0x58   :  { %364 = vmatmul.msk.f32.gmra.mxu0 %vm82_vm0, %v69_v11 }
  0x60   :  { %365 = vmatmul.msk.f32.gmra.mxu0 %vm82_vm0, %v70_v16 }
  0x68   :  { %366 = vmatmul.msk.f32.gmra.mxu0 %vm82_vm0, %v71_v21 }
  0x70   :  { %367 = vmatmul.msk.f32.gmra.mxu0 %vm82_vm0, %v72_v25 }
  0x78   :  { %368 = vmatmul.msk.f32.gmra.mxu0 %vm82_vm0, %v73_v30 }
  0x80   :  { %369 = vmatmul.msk.f32.gmra.mxu0 %vm82_vm0, %v74_v32 }
  0x88   :  { %370 = vmatmul.msk.f32.gmra.mxu0 %vm82_vm0, %v75_v33 }
  0x8d   :  { %v148_v35 = vpop.f32.mrf.mxu0 }
  0x8e   :  { %v149_v36 = vadd.f32 %v654_v34, %v148_v35 }
  0x90   :  { %394 = vtanh.f32 %v149_v36 }
  0x95   :  { %v151_v37 = vpop.f32.mrf.mxu0 }
  0x96   :  { %v395_v38 = vpop.eup %394  ;;  %v152_v39 = vadd.f32 %v654_v34, %v151_v37 }
  0x97   :  { %248 = vmatmul.f32.vlgmr.msra.gmra.mxu1 %v395_v38 }
  0x98   :  { %396 = vtanh.f32 %v152_v39 }
  0x9d   :  { %v154_v40 = vpop.f32.mrf.mxu0 }
  0x9e   :  { %v397_v41 = vpop.eup %396  ;;  %v155_v42 = vadd.f32 %v654_v34, %v154_v40 }
  0x9f   :  { %251 = vmatmul.f32.gmra.mxu1 %v397_v41 }
  0xa0   :  { %398 = vtanh.f32 %v155_v42 }
  0xa5   :  { %v157_v43 = vpop.f32.mrf.mxu0 }
  0xa6   :  { %v399_v44 = vpop.eup %398  ;;  %v158_v45 = vadd.f32 %v654_v34, %v157_v43 }
  0xa7   :  { %254 = vmatmul.f32.gmra.mxu1 %v399_v44 }
  0xa8   :  { %400 = vtanh.f32 %v158_v45 }
  0xad   :  { %v160_v46 = vpop.f32.mrf.mxu0 }
  0xae   :  { %v401_v47 = vpop.eup %400  ;;  %v161_v48 = vadd.f32 %v654_v34, %v160_v46 }
  0xaf   :  { %257 = vmatmul.f32.gmra.mxu1 %v401_v47 }
  0xb0   :  { %402 = vtanh.f32 %v161_v48 }
  0xb5   :  { %v163_v49 = vpop.f32.mrf.mxu0 }
  0xb6   :  { %v403_v50 = vpop.eup %402  ;;  %v164_v51 = vadd.f32 %v654_v34, %v163_v49 }
  0xb7   :  { %260 = vmatmul.f32.gmra.mxu1 %v403_v50 }
  0xb8   :  { %404 = vtanh.f32 %v164_v51 }
  0xbd   :  { %v166_v52 = vpop.f32.mrf.mxu0 }
  0xbe   :  { %v405_v53 = vpop.eup %404  ;;  %v167_v54 = vadd.f32 %v654_v34, %v166_v52 }
  0xbf   :  { %263 = vmatmul.f32.gmra.mxu1 %v405_v53 }
  0xc0   :  { %406 = vtanh.f32 %v167_v54 }
  0xc5   :  { %v169_v55 = vpop.f32.mrf.mxu0 }
  0xc6   :  { %v407_v56 = vpop.eup %406  ;;  %v170_v57 = vadd.f32 %v654_v34, %v169_v55 }
  0xc7   :  { %266 = vmatmul.f32.gmra.mxu1 %v407_v56 }
  0xc8   :  { %408 = vtanh.f32 %v170_v57 }
  0xcd   :  { %v172_v58 = vpop.f32.mrf.mxu0 }
  0xce   :  { %v409_v59 = vpop.eup %408  ;;  %v173_v60 = vadd.f32 %v654_v34, %v172_v58 }
  0xcf   :  { %269 = vmatmul.f32.gmra.mxu1 %v409_v59 }
  0xd0   :  { %410 = vtanh.f32 %v173_v60 }
  0xd5   :  { %v175_v61 = vpop.f32.mrf.mxu0 }
  0xd6   :  { %v411_v62 = vpop.eup %410  ;;  %v176_v63 = vadd.f32 %v654_v34, %v175_v61 }
  0xd7   :  { %272 = vmatmul.f32.gmra.mxu1 %v411_v62 }
  0xd8   :  { %412 = vtanh.f32 %v176_v63 }
  0xdd   :  { %v178_v0 = vpop.f32.mrf.mxu0 }
  0xde   :  { %v413_v1 = vpop.eup %412  ;;  %v179_v2 = vadd.f32 %v654_v34, %v178_v0 }
  0xdf   :  { %275 = vmatmul.f32.vlgmr.msra.gmra.mxu3 %v413_v1 }
  0xe0   :  { %414 = vtanh.f32 %v179_v2 }
  0xe5   :  { %v181_v3 = vpop.f32.mrf.mxu0 }
  0xe6   :  { %v415_v4 = vpop.eup %414  ;;  %v182_v5 = vadd.f32 %v654_v34, %v181_v3 }
  0xe7   :  { %278 = vmatmul.f32.gmra.mxu3 %v415_v4  ;;  %v313_v4 = vld [vmem:[%s695_s5] sm:$0x1] }
  0xe8   :  { %416 = vtanh.f32 %v182_v5  ;;  %v315_v5 = vstv %s696_s6 }
  0xed   :  { %v184_v6 = vpop.f32.mrf.mxu0 }
  0xee   :  { %v417_v7 = vpop.eup %416  ;;  %v185_v8 = vadd.f32 %v654_v34, %v184_v6 }
  0xef   :  { %281 = vmatmul.f32.gmra.mxu3 %v417_v7 }
  0xf0   :  { %418 = vtanh.f32 %v185_v8 }
  0xf5   :  { %v187_v9 = vpop.f32.mrf.mxu0 }
  0xf6   :  { %v419_v10 = vpop.eup %418  ;;  %v188_v11 = vadd.f32 %v654_v34, %v187_v9 }
  0xf7   :  { %284 = vmatmul.f32.gmra.mxu3 %v419_v10 }
  0xf8   :  { %420 = vtanh.f32 %v188_v11 }
  0xfd   :  { %v190_v12 = vpop.f32.mrf.mxu0 }
  0xfe   :  { %v421_v13 = vpop.eup %420  ;;  %v191_v14 = vadd.f32 %v654_v34, %v190_v12 }
  0xff   :  { %287 = vmatmul.f32.gmra.mxu3 %v421_v13 }
 0x100   :  { %422 = vtanh.f32 %v191_v14 }
 0x105   :  { %v193_v15 = vpop.f32.mrf.mxu0 }
 0x106   :  { %v423_v16 = vpop.eup %422  ;;  %v194_v17 = vadd.f32 %v654_v34, %v193_v15 }
 0x107   :  { %290 = vmatmul.f32.gmra.mxu3 %v423_v16 }
 0x108   :  { %424 = vtanh.f32 %v194_v17 }
 0x10e   :  { %v425_v18 = vpop.eup %424 }
 0x10f   :  { %293 = vmatmul.f32.gmra.mxu3 %v425_v18 }
 0x114   :  { %v672_v19 = vpop.f32.mrf.mxu1 }
 0x115   :  { %v250_v0 = vadd.f32 %v393_v31, %v672_v19 }
 0x11c   :  { %v674_v21 = vpop.f32.mrf.mxu1 }
 0x11d   :  { %v253_v62 = vadd.f32 %v393_v31, %v674_v21 }
 0x124   :  { %v255_v23 = vpop.f32.mrf.mxu1 }
 0x125   :  { %v256_v60 = vadd.f32 %v393_v31, %v255_v23 }
 0x12c   :  { %v258_v25 = vpop.f32.mrf.mxu1 }
 0x12d   :  { %v259_v58 = vadd.f32 %v393_v31, %v258_v25 }
 0x134   :  { %v261_v27 = vpop.f32.mrf.mxu1 }
 0x135   :  { %v262_v56 = vadd.f32 %v393_v31, %v261_v27 }
 0x13c   :  { %v264_v30 = vpop.f32.mrf.mxu1 }
 0x13d   :  { %v265_v54 = vadd.f32 %v393_v31, %v264_v30 }
 0x144   :  { %v267_v35 = vpop.f32.mrf.mxu1 }
 0x145   :  { %v268_v52 = vadd.f32 %v393_v31, %v267_v35 }
 0x14c   :  { %v270_v40 = vpop.f32.mrf.mxu1 }
 0x14d   :  { %v271_v50 = vadd.f32 %v393_v31, %v270_v40 }
 0x154   :  { %v273_v46 = vpop.f32.mrf.mxu1 }
 0x155   :  { %v274_v48 = vadd.f32 %v393_v31, %v273_v46 }
 0x162   :  { %v276_v20 = vpop.f32.mrf.mxu3 }
 0x163   :  { %v277_v45 = vadd.f32 %v393_v31, %v276_v20 }
 0x16a   :  { %v279_v22 = vpop.f32.mrf.mxu3 }
 0x16b   :  { %v280_v43 = vadd.f32 %v393_v31, %v279_v22 }
 0x172   :  { %v282_v24 = vpop.f32.mrf.mxu3 }
 0x173   :  { %v283_v41 = vadd.f32 %v393_v31, %v282_v24 }
 0x17a   :  { %v285_v26 = vpop.f32.mrf.mxu3 }
 0x17b   :  { %v286_v38 = vadd.f32 %v393_v31, %v285_v26 }
 0x182   :  { %v288_v28 = vpop.f32.mrf.mxu3 }
 0x183   :  { %v289_v36 = vadd.f32 %v393_v31, %v288_v28 }
 0x18a   :  { %v291_v29 = vpop.f32.mrf.mxu3 }
 0x18b   :  { %v292_v34 = vadd.f32 %v393_v31, %v291_v29 }
 0x192   :  { %v294_v32 = vpop.f32.mrf.mxu3 }
 0x193   :  { %v295_v33 = vadd.f32 %v393_v31, %v294_v32 }
 0x195   :  { %426 = vtanh.f32 %v295_v33 }
 0x196   :  { %428 = vtanh.f32 %v292_v34 }
 0x197   :  { %430 = vtanh.f32 %v289_v36 }
 0x198   :  { %432 = vtanh.f32 %v286_v38 }
 0x199   :  { %434 = vtanh.f32 %v283_v41 }
 0x19a   :  { %436 = vtanh.f32 %v280_v43 }
 0x19b   :  { %v427_v37 = vpop.eup %426  ;;  %438 = vtanh.f32 %v277_v45 }
 0x19c   :  { %316 = vmatpush.xpose.msra.mxu2 %v427_v37  ;;  %v429_v39 = vpop.eup %428  ;;  %440 = vtanh.f32 %v274_v48 }
 0x19d   :  { %v431_v42 = vpop.eup %430  ;;  %442 = vtanh.f32 %v271_v50 }
 0x19e   :  { %v433_v44 = vpop.eup %432  ;;  %444 = vtanh.f32 %v268_v52 }
 0x19f   :  { %v435_v47 = vpop.eup %434  ;;  %446 = vtanh.f32 %v265_v54 }
 0x1a0   :  { %317 = vmatpush.xpose.msra.mxu2 %v429_v39  ;;  %v437_v49 = vpop.eup %436  ;;  %448 = vtanh.f32 %v262_v56 }
 0x1a1   :  { %v439_v51 = vpop.eup %438  ;;  %450 = vtanh.f32 %v259_v58 }
 0x1a2   :  { %v441_v53 = vpop.eup %440  ;;  %452 = vtanh.f32 %v256_v60 }
 0x1a3   :  { %v443_v55 = vpop.eup %442  ;;  %454 = vtanh.f32 %v253_v62 }
 0x1a4   :  { %318 = vmatpush.xpose.msra.mxu2 %v431_v42  ;;  %v445_v57 = vpop.eup %444  ;;  %456 = vtanh.f32 %v250_v0 }
 0x1a5   :  { %v447_v59 = vpop.eup %446 }
 0x1a6   :  { %v449_v61 = vpop.eup %448 }
 0x1a7   :  { %v451_v63 = vpop.eup %450 }
 0x1a8   :  { %319 = vmatpush.xpose.msra.mxu2 %v433_v44  ;;  %v453_v1 = vpop.eup %452 }
 0x1a9   :  { %v455_v2 = vpop.eup %454 }
 0x1aa   :  { %v457_v3 = vpop.eup %456 }
 0x1ac   :  { %320 = vmatpush.xpose.msra.mxu2 %v435_v47 }
 0x1b0   :  { %321 = vmatpush.xpose.msra.mxu2 %v437_v49 }
 0x1b4   :  { %322 = vmatpush.xpose.msra.mxu2 %v439_v51 }
 0x1b8   :  { %323 = vmatpush.xpose.msra.mxu2 %v441_v53 }
 0x1bc   :  { %324 = vmatpush.xpose.msra.mxu2 %v443_v55 }
 0x1c0   :  { %325 = vmatpush.xpose.msra.mxu2 %v445_v57 }
 0x1c4   :  { %326 = vmatpush.xpose.msra.mxu2 %v447_v59 }
 0x1c8   :  { %327 = vmatpush.xpose.msra.mxu2 %v449_v61 }
 0x1cc   :  { %328 = vmatpush.xpose.msra.mxu2 %v451_v63 }
 0x1d0   :  { %329 = vmatpush.xpose.msra.mxu2 %v453_v1 }
 0x1d4   :  { %330 = vmatpush.xpose.msra.mxu2 %v455_v2 }
 0x1d8   :  { %331 = vmatpush.xpose.msra.mxu2 %v457_v3 }
 0x1db   :  { %332 = vmatmul.f32.vlgmr.msra.gmra.mxu2 %v313_v4 }
 0x25e   :  { %v333_v6 = vpop.f32.mrf.mxu2 }
 0x25f   :  { %v334_v7 = vadd.f32 %v333_v6, %v315_v5 }
 0x261   :  { %336 = vst [vmem:[#allocation8] sm:$0x1] %v334_v7 }
 0x262   :  { %347 = dma.vmem_to_hbm [thread:$0]  %s343_s24, 16, %s345_s27, [#allocation5]  }
 0x263   :  { %534 = dma.done.wait [#allocation5], 16  }
 0x264   :  { %535 = vsyncadd [#allocation5], 4294967280 }
 0x265   :  { %352 = vsyncpa [#allocation4], 1 }
 0x266   :  { %353 = vsyncpa [#allocation7], 1 }
 0x267   :  { %354 = vsyncpa [#allocation5], 1 }

</bundles_post_ra>
